<compile_context>
chip_gen: v6e
topology: v6e:2x2x1
jax: 0.10.0
libtpu: 0.0.40
codegen_flags: <defaults>
</compile_context>

<pallas_src>
import jax
import jax.numpy as jnp
from jax import lax
from jax.experimental import pallas as pl
from jax.experimental.pallas import tpu as pltpu


# --------------------------------------------------------------------------- #
# Kernels
# --------------------------------------------------------------------------- #

_STATIC_CHUNK_LIMIT = 64  # fully unroll the lane-chunk loop up to this count


def _make_pool_kernel(n_chunks):
    """Spatial-sum kernel: accumulate lane-dense (r_tile, 128) partial sums."""

    def _pool_kernel(x_ref, psum_ref):
        # New output block (new (row-tile, outer-spatial) pair): zero the acc.
        @pl.when(pl.program_id(2) == 0)
        def _():
            psum_ref[...] = jnp.zeros_like(psum_ref)

        # Pure VPU lane-chunk adds over the (r_tile, t) tile -> (r_tile, 128).
        # Avoids a cross-lane (XLU) reduce and a lane-1 masked store per step.
        if n_chunks <= _STATIC_CHUNK_LIMIT:
            acc = x_ref[:, 0:128].astype(jnp.float32)
            for cidx in range(1, n_chunks):
                acc = acc + x_ref[:, cidx * 128:(cidx + 1) * 128].astype(jnp.float32)
        else:
            def body(cidx, a):
                off = pl.multiple_of(cidx * 128, 128)
                return a + x_ref[:, pl.ds(off, 128)].astype(jnp.float32)

            acc = lax.fori_loop(
                1, n_chunks, body, x_ref[:, 0:128].astype(jnp.float32), unroll=8
            )
        psum_ref[...] += acc[None, :, :]

    return _pool_kernel


def _scale_kernel(x_ref, att_ref, o_ref):
    """out = x * att, att broadcast across the lane (spatial) axis."""
    o_ref[...] = (x_ref[...] * att_ref[...]).astype(o_ref.dtype)


# --------------------------------------------------------------------------- #
# Tiling / VMEM helpers
# --------------------------------------------------------------------------- #


def _round_up(v, m):
    return (v + m - 1) // m * m


def _tpu_vmem_capacity():
    try:
        return int(pltpu.get_tpu_info().vmem_capacity_bytes)
    except Exception:  # conservative fallback: assume the smallest (v7x) VMEM
        return 64 << 20


def _budgets():
    cap = _tpu_vmem_capacity()
    budget = max(16 << 20, cap - (16 << 20))          # >=16 MiB Mosaic headroom
    # Larger tiles on 128 MiB parts (v5e/v6e); stay modest on 64 MiB (v7x).
    target = (6 << 20) if cap >= (96 << 20) else (3 << 20)
    return target, budget


def _vmem_limit(tile_bytes, budget):
    # ~double-buffered in/out tiles + resident gate/partials + headroom.
    return int(min(max(6 * tile_bytes + (4 << 20), 16 << 20), budget))


def _choose_tiles(rows, hw, itemsize, target_bytes):
    """Return (r_tile, t, rows_final, hw_pad).

    r_tile: row tile (multiple of the sublane count), t: spatial tile
    (multiple of 128), rows_final / hw_pad: zero-padded array extents.
    """
    row_gran = max(8, 32 // itemsize)                 # 8 f32 / 16 bf16 / 32 i8
    hw_pad = _round_up(hw, 128)
    rows_pad = _round_up(rows, row_gran)
    bytes_per_row = hw_pad * itemsize

    if row_gran * bytes_per_row <= target_bytes:
        # Whole (padded) rows fit the target tile: tile rows, full spatial.
        r_tile = (target_bytes // bytes_per_row) // row_gran * row_gran
        r_tile = max(row_gran, min(r_tile, rows_pad))
        t = hw_pad
    else:
        # Very large spatial extent: tile the lane axis.
        t_max = max(128, (target_bytes // (row_gran * itemsize)) // 128 * 128)
        t = 128
        for cand in range(min(t_max, hw_pad), 127, -128):
            if hw_pad % cand == 0:
                t = cand
                break
        if t < max(128, t_max // 4):
            # No reasonable divisor of hw_pad: use a fixed 64-chunk tile and
            # pad hw up to a multiple of it (only a few % extra traffic here).
            t = min(t_max, 64 * 128)
            hw_pad = _round_up(hw_pad, t)
        r_tile = max(
            row_gran,
            min((target_bytes // (t * itemsize)) // row_gran * row_gran, rows_pad),
        )

    # Balance row tiles so row padding stays below one sublane granule per tile.
    n_r = max(1, -(-rows_pad // r_tile))
    r_tile = _round_up(-(-rows_pad // n_r), row_gran)
    rows_final = n_r * r_tile
    return r_tile, t, rows_final, hw_pad


def _pool_x_index_map(n_i):
    def index_map(i, o, k):
        return (i, o * n_i + k)

    return index_map


# --------------------------------------------------------------------------- #
# Wrapper
# --------------------------------------------------------------------------- #


def channel_attention(x, w1, b1, w2, b2, *, donate_x=False):
    """x: (N, C, H, W). w1: (C//r, C), b1: (C//r,), w2: (C, C//r), b2: (C,)."""
    n, c, h, w = x.shape
    hw = h * w
    rows = n * c
    itemsize = jnp.dtype(x.dtype).itemsize

    target_bytes, vmem_budget = _budgets()
    r_tile, t, rows_final, hw_pad = _choose_tiles(rows, hw, itemsize, target_bytes)
    n_r = rows_final // r_tile
    n_t = hw_pad // t
    n_o = 2 if (n_t >= 2 and n_t % 2 == 0) else 1     # cross-TensorCore split (v7x)
    n_i = n_t // n_o
    tile_bytes = r_tile * t * itemsize
    vmem_limit = _vmem_limit(tile_bytes, vmem_budget)

    x_flat = x.reshape(rows, hw)
    needs_pad = rows_final != rows or hw_pad != hw
    if needs_pad:
        # Zero padding: does not perturb the spatial sums; padded rows/columns
        # are sliced off the output below.
        x_flat = jnp.pad(x_flat, ((0, rows_final - rows), (0, hw_pad - hw)))

    # ---- Pass 1: lane-dense partial spatial sums --------------------------- #
    psum = pl.pallas_call(
        _make_pool_kernel(t // 128),
        out_shape=jax.ShapeDtypeStruct((n_o, rows_final, 128), jnp.float32),
        grid_spec=pltpu.PrefetchScalarGridSpec(
            num_scalar_prefetch=0,
            grid=(n_r, n_o, n_i),
            in_specs=[pl.BlockSpec((r_tile, t), _pool_x_index_map(n_i))],
            out_specs=pl.BlockSpec((1, r_tile, 128), lambda i, o, k: (o, i, 0)),
        ),
        compiler_params=pltpu.CompilerParams(
            dimension_semantics=("parallel", "parallel", "arbitrary"),
            vmem_limit_bytes=vmem_limit,
        ),
        cost_estimate=pl.CostEstimate(
            flops=rows_final * hw_pad,
            transcendentals=0,
            bytes_accessed=rows_final * hw_pad * itemsize
            + n_o * rows_final * 128 * 4,
        ),
    )(x_flat)

    # ---- Tiny squeeze/excite FCs + sigmoid on the pooled vector (XLA) ------ #
    # A C-wide matmul inside the kernel would use <1% of the MXU and force
    # layout shuffles; this work is negligible next to the two HBM sweeps of x.
    sums = jnp.sum(psum, axis=(0, 2))[:rows]                     # (rows,)
    pooled = sums.reshape(n, c) * (1.0 / hw)                     # true mean (unpadded hw)
    hdn = jnp.maximum(pooled @ w1.astype(jnp.float32).T + b1.astype(jnp.float32), 0.0)
    att = jax.nn.sigmoid(hdn @ w2.astype(jnp.float32).T + b2.astype(jnp.float32))
    # Gate in x.dtype so the pass-2 multiply runs natively (bf16 on v6e/v7x).
    att_rows = att.astype(x.dtype).reshape(rows, 1)
    if rows_final != rows:
        att_rows = jnp.pad(att_rows, ((0, rows_final - rows), (0, 0)))

    # ---- Pass 2: lane-dense broadcasted rescale (both axes parallel) ------- #
    out_flat = pl.pallas_call(
        _scale_kernel,
        out_shape=jax.ShapeDtypeStruct((rows_final, hw_pad), x.dtype),
        grid_spec=pltpu.PrefetchScalarGridSpec(
            num_scalar_prefetch=0,
            grid=(n_r, n_t),
            in_specs=[
                pl.BlockSpec((r_tile, t), lambda i, j: (i, j)),
                pl.BlockSpec((r_tile, 1), lambda i, j: (i, 0)),
            ],
            out_specs=pl.BlockSpec((r_tile, t), lambda i, j: (i, j)),
        ),
        compiler_params=pltpu.CompilerParams(
            dimension_semantics=("parallel", "parallel"),
            vmem_limit_bytes=vmem_limit,
        ),
        cost_estimate=pl.CostEstimate(
            flops=rows_final * hw_pad,
            transcendentals=0,
            bytes_accessed=2 * rows_final * hw_pad * itemsize + rows_final * itemsize,
        ),
        input_output_aliases=({0: 0} if donate_x else {}),
    )(x_flat, att_rows)

    out = out_flat[:rows, :hw] if needs_pad else out_flat
    return out.reshape(n, c, h, w)


# --------------------------------------------------------------------------- #
# Reference & test
# --------------------------------------------------------------------------- #


def _reference(x, w1, b1, w2, b2):
    # Pure-JAX reference mirroring the PyTorch forward.
    pooled = jnp.mean(x, axis=(2, 3))                        # (N, C)
    hdn = jnp.maximum(pooled @ w1.T + b1, 0.0)               # (N, C//r)
    a = jax.nn.sigmoid(hdn @ w2.T + b2)                      # (N, C)
    return x * a[:, :, None, None]


if __name__ == "__main__":
    # Small shapes consistent with the module: reduction=16 => C must be >= 16.
    N, C, H, W = 2, 32, 16, 16
    reduction = 16
    Cr = C // reduction  # 2

    key = jax.random.PRNGKey(0)
    kx, k1, k2, k3, k4 = jax.random.split(key, 5)

    x = jax.random.normal(kx, (N, C, H, W), dtype=jnp.float32)
    # Deterministic synthetic parameters (Conv2d 1x1 weights squeezed to 2-D).
    w1 = 0.1 * jax.random.normal(k1, (Cr, C), dtype=jnp.float32)   # Conv2d(C, Cr, 1).weight
    b1 = 0.1 * jax.random.normal(k2, (Cr,), dtype=jnp.float32)
    w2 = 0.1 * jax.random.normal(k3, (C, Cr), dtype=jnp.float32)   # Conv2d(Cr, C, 1).weight
    b2 = 0.1 * jax.random.normal(k4, (C,), dtype=jnp.float32)

    out = jax.block_until_ready(channel_attention(x, w1, b1, w2, b2))

    ref = _reference(x, w1, b1, w2, b2)
    assert out.shape == (N, C, H, W)
    assert jnp.allclose(out, ref, atol=1e-5, rtol=1e-5), "mismatch vs reference"

    print("KERNEL_OK")
</pallas_src>

<mosaic_0001>
module attributes {stable_mosaic.version = 11 : i64} {
  func.func @_pool_kernel(%arg0: i32, %arg1: i32, %arg2: i32, %arg3: memref<64x256xf32, #tpu.memory_space<vmem>>, %arg4: memref<1x64x128xf32, #tpu.memory_space<vmem>>) attributes {dimension_semantics = [#tpu.dimension_semantics<parallel>, #tpu.dimension_semantics<parallel>, #tpu.dimension_semantics<arbitrary>], iteration_bounds = array<i64: 1, 1, 1>, scalar_prefetch = 0 : i64, scratch_operands = 0 : i64, tpu.core_type = #tpu.core_type<tc>, window_params = [{transform_indices = @transform_0, window_bounds = array<i64: 64, 256>}, {transform_indices = @transform_1, window_bounds = array<i64: 1, 64, 128>}]} {
    %c0_i32 = arith.constant 0 : i32
    %0 = arith.cmpi eq, %arg2, %c0_i32 : i32
    %1 = arith.extui %0 : i1 to i32
    %c0_i32_0 = arith.constant 0 : i32
    %2 = arith.cmpi ne, %1, %c0_i32_0 : i32
    scf.if %2 {
      %cst = arith.constant 0.000000e+00 : f32
      %10 = vector.broadcast %cst : f32 to vector<1x64x128xf32>
      %c0_9 = arith.constant 0 : index
      %c0_10 = arith.constant 0 : index
      %c0_11 = arith.constant 0 : index
      %11 = vector.load %arg4[%c0_9, %c0_10, %c0_11] : memref<1x64x128xf32, #tpu.memory_space<vmem>>, vector<1x64x128xf32>
      tpu.vector_store %arg4[%c0_9, %c0_10, %c0_11], %10 {strides = array<i32>} : memref<1x64x128xf32, #tpu.memory_space<vmem>>, vector<1x64x128xf32>,
    } else {
    }
    %c0 = arith.constant 0 : index
    %c0_1 = arith.constant 0 : index
    %3 = vector.load %arg3[%c0, %c0_1] : memref<64x256xf32, #tpu.memory_space<vmem>>, vector<64x128xf32>
    %c0_2 = arith.constant 0 : index
    %c128 = arith.constant 128 : index
    %4 = vector.load %arg3[%c0_2, %c128] : memref<64x256xf32, #tpu.memory_space<vmem>>, vector<64x128xf32>
    %5 = arith.addf %3, %4 : vector<64x128xf32>
    %c0_3 = arith.constant 0 : index
    %c0_4 = arith.constant 0 : index
    %c0_5 = arith.constant 0 : index
    %6 = vector.load %arg4[%c0_3, %c0_4, %c0_5] : memref<1x64x128xf32, #tpu.memory_space<vmem>>, vector<1x64x128xf32>
    %7 = vector.shape_cast %5 : vector<64x128xf32> to vector<1x64x128xf32>
    %8 = arith.addf %6, %7 : vector<1x64x128xf32>
    %c0_6 = arith.constant 0 : index
    %c0_7 = arith.constant 0 : index
    %c0_8 = arith.constant 0 : index
    %9 = vector.load %arg4[%c0_6, %c0_7, %c0_8] : memref<1x64x128xf32, #tpu.memory_space<vmem>>, vector<1x64x128xf32>
    tpu.vector_store %arg4[%c0_6, %c0_7, %c0_8], %8 {strides = array<i32>} : memref<1x64x128xf32, #tpu.memory_space<vmem>>, vector<1x64x128xf32>,
    return
  }
  func.func @transform_0(%arg0: i32, %arg1: i32, %arg2: i32) -> (i32, i32) {
    %c1_i32 = arith.constant 1 : i32
    %0 = arith.muli %arg1, %c1_i32 : i32
    %1 = arith.addi %0, %arg2 : i32
    %c0_i32 = arith.constant 0 : i32
    return %arg0, %1 : i32, i32
  }
  func.func @transform_1(%arg0: i32, %arg1: i32, %arg2: i32) -> (i32, i32, i32) {
    %c0_i32 = arith.constant 0 : i32
    %c0_i32_0 = arith.constant 0 : i32
    return %arg1, %arg0, %c0_i32 : i32, i32, i32
  }
}

</mosaic_0001>

<bundles_post_ra>
// kernel: tpu_custom_call.1
= control target key start
LH: loop header
LB: loop body
LE: loop exit
PB: predicated region body
PF: predicated region fallthrough
CT: control target
= control target key end

     0   :  { %6 = vsyncpa [#allocation3], 0  ;;  %s179_s0 = inlined_call_operand.hbm [shape: f32[64,256], index: 0, kind: input, shape index: {}]   ;;  %s180_s1 = inlined_call_operand.hbm [shape: f32[1,64,128], index: 1, kind: output, shape index: {}]  }
   0x1   :  { %7 = vsyncpa [#allocation4], 0  ;;  %s157_s6 = smov [#allocation2]  }
   0x2   :  { %s17_s7 = sshll.u32 %s157_s6, 4  ;;  %s18_s7 = int_to_ptr.vmem [resolvable:$true] %s17_s7 }
   0x3   :  { %s121_s8 = scalar_lea.vmem %s18_s7, 2048  ;;  %p126_p1 = scmp.lt.s32.totalorder %s18_s7, %s18_s7 }
   0x4   :  { %p122_p0 = scmp.ne.s32.totalorder %s18_s7, %s121_s8  ;;  %p127_p2 = scmp.lt.s32.totalorder %s121_s8, %s121_s8 }
   0x6   :  { %p128_p3 = por %p127_p2, %p126_p1 }
   0x8   :  { %p129_p4 = pnand %p128_p3, %p122_p0 }
   0xa   :  { %132 = shalt.err (!%p129_p4)
}
   0xb   :  { %s158_s9 = smov 256   ;;  %s159_s10 = smov 16  }
   0xc   :  { %23 = dma.hbm_to_vmem [thread:$0]  %s179_s0, 2048, %s18_s7, [#allocation3], %s158_s9, %s158_s9, %s159_s10  }
   0xd   :  { %153 = dma.done.wait [#allocation3], 2048  }
   0xe   :  { %154 = vsyncadd [#allocation3], 4294965248  ;;  %v41_v0 = vld [vmem:[#allocation2] sm:$0xff]  ;;  %v49_v1 = vld [vmem:[#allocation2 + $0x8] sm:$0xff]  ;;  %s160_s0 = smov [#allocation5]  }
   0xf   :  { %v42_v2 = vld [vmem:[#allocation2 + $0x10] sm:$0xff]  ;;  %v57_v3 = vadd.f32 %v49_v1, %v41_v0  ;;  %v50_v4 = vld [vmem:[#allocation2 + $0x18] sm:$0xff]  ;;  %v43_v5 = vld [vmem:[#allocation2 + $0x20] sm:$0xff]  ;;  %s94_s13 = sshll.u32 %s160_s0, 4  ;;  %s95_s13 = int_to_ptr.vmem [resolvable:$true] %s94_s13 }
  0x10   :  { %v51_v6 = vld [vmem:[#allocation2 + $0x28] sm:$0xff]  ;;  %v58_v7 = vadd.f32 %v50_v4, %v42_v2  ;;  %v44_v9 = vld [vmem:[#allocation2 + $0x30] sm:$0xff]  ;;  %v52_v10 = vld [vmem:[#allocation2 + $0x38] sm:$0xff]  ;;  %s133_s14 = scalar_lea.vmem %s95_s13, 1024  ;;  %p138_p6 = scmp.lt.s32.totalorder %s95_s13, %s95_s13 }
  0x11   :  { %v59_v8 = vadd.f32 %v51_v6, %v43_v5  ;;  %v45_v11 = vld [vmem:[#allocation2 + $0x40] sm:$0xff]  ;;  %v60_v12 = vadd.f32 %v52_v10, %v44_v9  ;;  %v53_v13 = vld [vmem:[#allocation2 + $0x48] sm:$0xff]  ;;  %v46_v14 = vld [vmem:[#allocation2 + $0x50] sm:$0xff]  ;;  %81 = vst [vmem:[#allocation5] sm:$0xff] %v57_v3  ;;  %p134_p5 = scmp.ne.s32.totalorder %s95_s13, %s133_s14  ;;  %p139_p7 = scmp.lt.s32.totalorder %s133_s14, %s133_s14 }
  0x12   :  { %v54_v15 = vld [vmem:[#allocation2 + $0x58] sm:$0xff]  ;;  %v61_v16 = vadd.f32 %v53_v13, %v45_v11  ;;  %v47_v18 = vld [vmem:[#allocation2 + $0x60] sm:$0xff]  ;;  %v55_v19 = vld [vmem:[#allocation2 + $0x68] sm:$0xff]  ;;  %82 = vst [vmem:[#allocation5 + $0x8] sm:$0xff] %v58_v7 }
  0x13   :  { %v62_v17 = vadd.f32 %v54_v15, %v46_v14  ;;  %v48_v20 = vld [vmem:[#allocation2 + $0x70] sm:$0xff]  ;;  %v63_v21 = vadd.f32 %v55_v19, %v47_v18  ;;  %v56_v22 = vld [vmem:[#allocation2 + $0x78] sm:$0xff]  ;;  %83 = vst [vmem:[#allocation5 + $0x10] sm:$0xff] %v59_v8  ;;  %84 = vst [vmem:[#allocation5 + $0x18] sm:$0xff] %v60_v12  ;;  %p140_p8 = por %p139_p7, %p138_p6 }
  0x14   :  { %v64_v23 = vadd.f32 %v56_v22, %v48_v20  ;;  %85 = vst [vmem:[#allocation5 + $0x20] sm:$0xff] %v61_v16 }
  0x15   :  { %86 = vst [vmem:[#allocation5 + $0x28] sm:$0xff] %v62_v17  ;;  %87 = vst [vmem:[#allocation5 + $0x30] sm:$0xff] %v63_v21  ;;  %p141_p9 = pnand %p140_p8, %p134_p5 }
  0x16   :  { %88 = vst [vmem:[#allocation5 + $0x38] sm:$0xff] %v64_v23 }
  0x17   :  { %144 = shalt.err (!%p141_p9)
}
  0x18   :  { %s161_s15 = smov 128   ;;  %s162_s16 = smov 8  }
  0x19   :  { %100 = dma.vmem_to_hbm [thread:$0]  %s95_s13, 1024, %s180_s1, [#allocation4], %s161_s15, %s161_s15, %s162_s16  }
  0x1a   :  { %155 = dma.done.wait [#allocation4], 1024  }
  0x1b   :  { %156 = vsyncadd [#allocation4], 4294966272 }
  0x1c   :  { %104 = vsyncpa [#allocation3], 1 }
  0x1d   :  { %105 = vsyncpa [#allocation4], 1 }

</bundles_post_ra>
